<compile_context>
chip_gen: v7x
topology: tpu7x:2x2x1
jax: 0.10.0
libtpu: 0.0.40
codegen_flags: <defaults>
</compile_context>

<pallas_src>
import jax
import jax.numpy as jnp
from jax.experimental import pallas as pl
from jax.experimental.pallas import tpu as pltpu


def mock_game_kernel(param_ref, o_ref):
    # Scalar identity passthrough in SMEM: one sld + one sst, no vector tiles.
    o_ref[0] = param_ref[0]


def mock_game_forward(param, *args, **kwargs):
    """Mirrors MockGame.forward: ignores *args/**kwargs, returns (param, {'acc': 1})."""
    out = pl.pallas_call(
        mock_game_kernel,
        out_shape=jax.ShapeDtypeStruct(param.shape, param.dtype),
        in_specs=[pl.BlockSpec(memory_space=pltpu.MemorySpace.SMEM)],
        out_specs=pl.BlockSpec(memory_space=pltpu.MemorySpace.SMEM),
        input_output_aliases={0: 0},
        cost_estimate=pl.CostEstimate(flops=0, transcendentals=0, bytes_accessed=8),
    )(param)
    # TODO(synk): the {'acc': 1} metric dict is pure Python metadata with no
    # Pallas/tensor equivalent; it is returned host-side exactly as in PyTorch.
    return out, {"acc": 1}


def reference_forward(param, *args, **kwargs):
    return param, {"acc": 1}


if __name__ == "__main__":
    key = jax.random.PRNGKey(0)

    # Parameter exactly as in the module: torch.Tensor([0]) -> shape (1,), value 0.0
    param = jnp.zeros((1,), dtype=jnp.float32)

    # Forward ignores its inputs; build a small deterministic dummy arg anyway
    # to exercise the *args / **kwargs path.
    dummy_x = jax.random.normal(key, (2, 4), dtype=jnp.float32)

    out_param, out_metrics = mock_game_forward(param, dummy_x, step=0)
    out_param = jax.block_until_ready(out_param)

    ref_param, ref_metrics = reference_forward(param, dummy_x, step=0)

    assert out_param.shape == (1,)
    assert out_param.dtype == jnp.float32
    assert jnp.allclose(out_param, ref_param, atol=0.0, rtol=0.0), "param mismatch"
    assert out_metrics == ref_metrics, "metrics mismatch"

    print("KERNEL_OK")
</pallas_src>

<mosaic_0001>
module attributes {stable_mosaic.version = 11 : i64} {
  func.func @mock_game_kernel(%arg0: memref<1xf32, #tpu.memory_space<smem>>, %arg1: memref<1xf32, #tpu.memory_space<smem>>) attributes {dimension_semantics = [], scalar_prefetch = 0 : i64, scratch_operands = 0 : i64, tpu.core_type = #tpu.core_type<tc>} {
    %c0 = arith.constant 0 : index
    %0 = memref.load %arg0[%c0] : memref<1xf32, #tpu.memory_space<smem>>
    %c0_0 = arith.constant 0 : index
    %1 = memref.load %arg1[%c0_0] : memref<1xf32, #tpu.memory_space<smem>>
    memref.store %0, %arg1[%c0_0] : memref<1xf32, #tpu.memory_space<smem>>
    return
  }
}

</mosaic_0001>

<bundles_post_ra>
// kernel: tpu_custom_call.1
= control target key start
LH: loop header
LB: loop body
LE: loop exit
PB: predicated region body
PF: predicated region fallthrough
CT: control target
= control target key end

     0   :  { %7 = vsyncpa [#allocation4], 0  ;;  %s65_s0 = inlined_call_operand.<no memory space> [shape: f32[1], index: 0, kind: input, shape index: {}, may-alias: {0,1}]   ;;  %s66_s1 = inlined_call_operand.hbm [shape: f32[1], index: 1, kind: output, shape index: {}, may-alias: {0,1}]  }
   0x1   :  { %12 = sst [smem:[#allocation3]] %s65_s0  ;;  %s27_s10 = scalar_lea.hbm %s66_s1, 16 }
   0x2   :  { %p28_p0 = scmp.ne.s32.totalorder %s66_s1, %s27_s10  ;;  %p31_p1 = scmp.lt.u32.totalorder %s27_s10, %s66_s1 }
   0x4   :  { %p33_p2 = pnand %p31_p1, %p28_p0 }
   0x6   :  { %36 = shalt.err (!%p33_p2)
}
   0x7   :  { %s39_s15 = smov [#allocation3]  }
   0x8   :  { %20 = dma.smem_to_hbm %s39_s15, 16, %s66_s1, [#allocation4]  }
   0x9   :  { %37 = dma.done.wait [#allocation4], 16  }
   0xa   :  { %38 = vsyncadd [#allocation4], 4294967280 }
   0xb   :  { %24 = sfence }
   0xc   :  { %25 = vsyncpa [#allocation4], 1 }

</bundles_post_ra>
